<compile_context>
chip_gen: v5e
topology: v5e:2x2
jax: 0.10.0
libtpu: 0.0.40
codegen_flags: <defaults>
</compile_context>

<pallas_src>
import functools

import jax
import jax.numpy as jnp
from jax.experimental import pallas as pl
from jax.experimental.pallas import tpu as pltpu

LN_EPS = 1e-5  # PyTorch nn.LayerNorm default


def _round_up(x, m):
    return ((x + m - 1) // m) * m


def _vmem_budget_bytes():
    """Per-generation VMEM budget: ~85% of physical capacity."""
    try:
        cap = int(pltpu.get_tpu_info().vmem_capacity_bytes)
    except Exception:
        cap = 64 << 20  # conservative fallback (v7x per-core VMEM)
    return max(int(cap * 0.85), 32 << 20)


_HAS_BUFFERED = hasattr(pl, "Buffered")


def _spec(block_shape, index_map, *, single_buffer=False):
    """BlockSpec; single-buffered for grid-constant blocks when supported."""
    if single_buffer and _HAS_BUFFERED:
        try:
            return pl.BlockSpec(block_shape, index_map,
                                pipeline_mode=pl.Buffered(1))
        except TypeError:  # older jax without pipeline_mode kwarg
            pass
    return pl.BlockSpec(block_shape, index_map)


def _pick_row_tile(rows_p, cap):
    """Largest multiple of 8 <= cap that divides rows_p (rows_p % 8 == 0)."""
    cap = max(8, min(cap, rows_p))
    cap -= cap % 8
    for t in range(cap, 7, -8):
        if rows_p % t == 0:
            return t
    return 8


# --------------------------- kernel ---------------------------------------
def prenorm_linear_kernel(x_ref, w_ref, b_ref, o_ref, z_ref):
    # x_ref: (tm, D) input rows; w_ref: (D, tn) bf16 (gamma pre-folded);
    # b_ref: (1, tn) f32 (beta/bias pre-folded); o_ref: (tm, tn);
    # z_ref: (tm, D) bf16 scratch holding normalized rows — computed once per
    # row tile (j == 0) and reused for every N tile.
    @pl.when(pl.program_id(1) == 0)
    def _():
        x = x_ref[...].astype(jnp.float32)
        mean = jnp.mean(x, axis=-1, keepdims=True)
        centered = x - mean
        var = jnp.mean(centered * centered, axis=-1, keepdims=True)
        z_ref[...] = (centered * jax.lax.rsqrt(var + LN_EPS)).astype(jnp.bfloat16)

    # fn: Linear — bf16 MXU matmul, f32 accumulation.
    y = jnp.dot(z_ref[...], w_ref[...], preferred_element_type=jnp.float32)
    o_ref[...] = (y + b_ref[...]).astype(o_ref.dtype)


# ----------------------- parameter preparation ----------------------------
def prenorm_linear_prepare(gamma, beta, w, b):
    """Fold LayerNorm affine into the Linear layer; do once at init time.

      (z*gamma + beta) @ W + b == z @ (gamma[:,None]*W) + (beta @ W + b)

    Also pads the output dim to a lane multiple (128) and casts W to bf16 so
    none of these full-weight HBM passes happen in the per-call hot path.
    Returns (w_bf16 (D, n_p), bias_f32 (1, n_p), n_out).
    """
    D, N = w.shape
    w32 = w.astype(jnp.float32)
    w_fold = gamma.astype(jnp.float32)[:, None] * w32
    b_fold = beta.astype(jnp.float32) @ w32 + b.astype(jnp.float32)
    n_p = _round_up(N, 128)
    if n_p != N:
        w_fold = jnp.pad(w_fold, ((0, 0), (0, n_p - N)))
        b_fold = jnp.pad(b_fold, (0, n_p - N))
    return w_fold.astype(jnp.bfloat16), b_fold.reshape(1, n_p), N


# ----------------------------- wrapper -------------------------------------
@functools.partial(jax.jit, static_argnames=("n_out", "tile_m"))
def prenorm_linear(x, w_bf, b2, *, n_out, tile_m=256):
    """x: (B, S, D). Returns fn(LayerNorm(x)) with fn = Linear(D, n_out)."""
    B, S, D = x.shape
    n_p = w_bf.shape[1]
    rows = B * S
    x2 = x.reshape(rows, D)

    # Row tiling: avoid padding when rows is already a multiple of 8 by
    # picking a tile that divides the row count (LayerNorm is row-local).
    rows_p = _round_up(rows, 8)
    if rows_p != rows:
        x2 = jnp.pad(x2, ((0, rows_p - rows), (0, 0)))
    tm = _pick_row_tile(rows_p, tile_m)
    if tm < 64 and rows_p >= 8 * tile_m:
        # No decent divisor — pad the tail rather than run tiny row tiles.
        tm = max(min(tile_m, 256) - min(tile_m, 256) % 8, 8)
        new_rows_p = _round_up(rows_p, tm)
        if new_rows_p != x2.shape[0]:
            x2 = jnp.pad(x2, ((0, new_rows_p - x2.shape[0]), (0, 0)))
        rows_p = new_rows_p

    budget = _vmem_budget_bytes()
    x_sz = x2.dtype.itemsize
    o_sz = x.dtype.itemsize
    w_bufs_resident = 1 if _HAS_BUFFERED else 2

    def vmem_need(tm_, tn_, w_bufs):
        x_blk = 2 * tm_ * D * x_sz          # double-buffered input rows
        w_blk = w_bufs * D * tn_ * 2        # bf16 weight block(s)
        b_blk = w_bufs * 8 * tn_ * 4        # (1, tn) pads to (8, tn) sublanes
        z_blk = tm_ * D * 2                 # normalized-row scratch
        o_blk = 2 * tm_ * tn_ * o_sz        # double-buffered output
        y_blk = tm_ * tn_ * 4               # f32 matmul result before cast
        return x_blk + w_blk + b_blk + z_blk + o_blk + y_blk

    # Prefer a grid-constant, fully VMEM-resident weight (N grid collapses to
    # 1) so W is DMA'd from HBM exactly once, not once per row tile.
    if vmem_need(tm, n_p, w_bufs_resident) <= budget:
        tn = n_p
    else:
        # Tile N: largest 128-multiple divisor of n_p that fits with
        # double-buffered weight blocks.
        tn = 128
        k = n_p // 128
        for d in range(k, 0, -1):
            if k % d == 0 and vmem_need(tm, d * 128, 2) <= budget:
                tn = d * 128
                break
    grid_n = n_p // tn

    # Ensure >=2 blocks on the parallel row axis (v7x has 2 TensorCores).
    if grid_n == 1 and rows_p // tm < 2 and rows_p >= 16:
        tm = _pick_row_tile(rows_p, rows_p // 2)

    grid = (rows_p // tm, grid_n)
    const_wb = grid_n == 1   # weight/bias blocks are grid-constant

    out = pl.pallas_call(
        prenorm_linear_kernel,
        out_shape=jax.ShapeDtypeStruct((rows_p, n_p), x.dtype),
        grid_spec=pltpu.PrefetchScalarGridSpec(
            num_scalar_prefetch=0,
            grid=grid,
            in_specs=[
                pl.BlockSpec((tm, D), lambda i, j: (i, 0)),              # x rows
                _spec((D, tn), lambda i, j: (0, j), single_buffer=const_wb),  # W'
                _spec((1, tn), lambda i, j: (0, j), single_buffer=const_wb),  # b'
            ],
            out_specs=pl.BlockSpec((tm, tn), lambda i, j: (i, j)),
            scratch_shapes=[pltpu.VMEM((tm, D), jnp.bfloat16)],          # z cache
        ),
        compiler_params=pltpu.CompilerParams(
            # j is "arbitrary": the normalized-row scratch is carried across
            # the N tiles of a given row tile.
            dimension_semantics=("parallel", "arbitrary"),
            vmem_limit_bytes=budget,
        ),
    )(x2, w_bf, b2)

    return out[:rows, :n_out].reshape(B, S, n_out)


# ---------------- references for correctness checking ----------------
def reference_f32(x, gamma, beta, w, b):
    """Pure-f32 PyTorch semantics: Linear(LayerNorm(x))."""
    xf = x.astype(jnp.float32)
    mean = jnp.mean(xf, axis=-1, keepdims=True)
    var = jnp.mean((xf - mean) ** 2, axis=-1, keepdims=True)
    xn = (xf - mean) * jax.lax.rsqrt(var + LN_EPS) * gamma + beta
    return (xn @ w.astype(jnp.float32) + b).astype(x.dtype)


def reference_matched(x, gamma, beta, w, b):
    """Same math as the kernel (bf16 matmul inputs, f32 accumulation)."""
    xf = x.astype(jnp.float32)
    mean = jnp.mean(xf, axis=-1, keepdims=True)
    var = jnp.mean((xf - mean) ** 2, axis=-1, keepdims=True)
    z = (xf - mean) * jax.lax.rsqrt(var + LN_EPS)
    w_fold = (gamma[:, None] * w.astype(jnp.float32)).astype(jnp.bfloat16)
    b_fold = beta @ w.astype(jnp.float32) + b
    y = (z.astype(jnp.bfloat16).astype(jnp.float32)
         @ w_fold.astype(jnp.float32) + b_fold)
    return y.astype(x.dtype)


if __name__ == "__main__":
    # TODO(synk): PyTorch `fn` is arbitrary; instantiated here as Linear(D, D).
    B, S, D = 2, 8, 32
    key = jax.random.PRNGKey(0)
    kx, kg, kbt, kw, kb = jax.random.split(key, 5)

    x = jax.random.normal(kx, (B, S, D), dtype=jnp.float32)

    # LayerNorm affine params (non-trivial, to exercise the folding).
    gamma = 1.0 + 0.1 * jax.random.normal(kg, (D,), dtype=jnp.float32)
    beta = 0.1 * jax.random.normal(kbt, (D,), dtype=jnp.float32)

    # fn = Linear(D, D)
    bound = 1.0 / (D ** 0.5)
    w = jax.random.uniform(kw, (D, D), minval=-bound, maxval=bound,
                           dtype=jnp.float32)
    b = jax.random.uniform(kb, (D,), minval=-bound, maxval=bound,
                           dtype=jnp.float32)

    # One-time parameter prep (fold + pad + bf16 cast) — out of the hot path.
    w_bf, b2, n_out = prenorm_linear_prepare(gamma, beta, w, b)

    out = prenorm_linear(x, w_bf, b2, n_out=n_out)
    out = jax.block_until_ready(out)
    assert out.shape == (B, S, D)

    # Precision-matched reference (bf16 matmul inputs, f32 accumulation)...
    ref_m = reference_matched(x, gamma, beta, w, b)
    assert jnp.allclose(out, ref_m, atol=1e-3, rtol=1e-3), (
        float(jnp.max(jnp.abs(out - ref_m))))
    # ...and within bf16 tolerance of the exact PyTorch-semantics reference.
    ref = reference_f32(x, gamma, beta, w, b)
    assert jnp.allclose(out, ref, atol=3e-2, rtol=3e-2), (
        float(jnp.max(jnp.abs(out - ref))))

    print("KERNEL_OK")
</pallas_src>

<mosaic_0001>
module attributes {stable_mosaic.version = 11 : i64} {
  func.func @prenorm_linear_kernel(%arg0: i32, %arg1: i32, %arg2: memref<8x32xf32, #tpu.memory_space<vmem>>, %arg3: memref<32x128xbf16, #tpu.memory_space<vmem>>, %arg4: memref<1x128xf32, #tpu.memory_space<vmem>>, %arg5: memref<8x128xf32, #tpu.memory_space<vmem>>, %arg6: memref<8x32xbf16, #tpu.memory_space<vmem>>) attributes {dimension_semantics = [#tpu.dimension_semantics<parallel>, #tpu.dimension_semantics<arbitrary>], iteration_bounds = array<i64: 2, 1>, scalar_prefetch = 0 : i64, scratch_operands = 1 : i64, tpu.core_type = #tpu.core_type<tc>, window_params = [{transform_indices = @transform_0, window_bounds = array<i64: 8, 32>}, {pipeline_mode = #tpu.pipeline_mode<synchronous>, transform_indices = @transform_1, window_bounds = array<i64: 32, 128>}, {pipeline_mode = #tpu.pipeline_mode<synchronous>, transform_indices = @transform_2, window_bounds = array<i64: 1, 128>}, {transform_indices = @transform_3, window_bounds = array<i64: 8, 128>}]} {
    %c0_i32 = arith.constant 0 : i32
    %0 = arith.cmpi eq, %arg1, %c0_i32 : i32
    %1 = arith.extui %0 : i1 to i32
    %c0_i32_0 = arith.constant 0 : i32
    %2 = arith.cmpi ne, %1, %c0_i32_0 : i32
    scf.if %2 {
      %c0_8 = arith.constant 0 : index
      %c0_9 = arith.constant 0 : index
      %10 = vector.load %arg2[%c0_8, %c0_9] : memref<8x32xf32, #tpu.memory_space<vmem>>, vector<8x32xf32>
      %cst_10 = arith.constant dense<0.000000e+00> : vector<8xf32>
      %11 = vector.multi_reduction <add>, %10, %cst_10 [1] : vector<8x32xf32> to vector<8xf32>
      %12 = vector.shape_cast %11 : vector<8xf32> to vector<8x1xf32>
      %cst_11 = arith.constant 3.200000e+01 : f32
      %13 = vector.broadcast %cst_11 : f32 to vector<8x1xf32>
      %14 = arith.divf %12, %13 : vector<8x1xf32>
      %15 = vector.broadcast %14 : vector<8x1xf32> to vector<8x32xf32>
      %16 = arith.subf %10, %15 : vector<8x32xf32>
      %17 = arith.mulf %16, %16 : vector<8x32xf32>
      %cst_12 = arith.constant dense<0.000000e+00> : vector<8xf32>
      %18 = vector.multi_reduction <add>, %17, %cst_12 [1] : vector<8x32xf32> to vector<8xf32>
      %19 = vector.shape_cast %18 : vector<8xf32> to vector<8x1xf32>
      %cst_13 = arith.constant 3.200000e+01 : f32
      %20 = vector.broadcast %cst_13 : f32 to vector<8x1xf32>
      %21 = arith.divf %19, %20 : vector<8x1xf32>
      %cst_14 = arith.constant 9.99999974E-6 : f32
      %22 = vector.broadcast %cst_14 : f32 to vector<8x1xf32>
      %23 = arith.addf %21, %22 : vector<8x1xf32>
      %24 = math.rsqrt %23 : vector<8x1xf32>
      %25 = vector.broadcast %24 : vector<8x1xf32> to vector<8x32xf32>
      %26 = arith.mulf %16, %25 : vector<8x32xf32>
      %27 = arith.truncf %26 : vector<8x32xf32> to vector<8x32xbf16>
      %c0_15 = arith.constant 0 : index
      %c0_16 = arith.constant 0 : index
      %28 = vector.load %arg6[%c0_15, %c0_16] : memref<8x32xbf16, #tpu.memory_space<vmem>>, vector<8x32xbf16>
      tpu.vector_store %arg6[%c0_15, %c0_16], %27 {strides = array<i32>} : memref<8x32xbf16, #tpu.memory_space<vmem>>, vector<8x32xbf16>,
    } else {
    }
    %c0 = arith.constant 0 : index
    %c0_1 = arith.constant 0 : index
    %3 = vector.load %arg6[%c0, %c0_1] : memref<8x32xbf16, #tpu.memory_space<vmem>>, vector<8x32xbf16>
    %c0_2 = arith.constant 0 : index
    %c0_3 = arith.constant 0 : index
    %4 = vector.load %arg3[%c0_2, %c0_3] : memref<32x128xbf16, #tpu.memory_space<vmem>>, vector<32x128xbf16>
    %cst = arith.constant dense<0.000000e+00> : vector<8x128xf32>
    %5 = tpu.matmul %3, %4, %cst {dimension_numbers = #tpu.dot_dimension_numbers<[1], [0], [0], [1], [0, 0, 1, 1], [], []>} : vector<8x32xbf16>, vector<32x128xbf16>, vector<8x128xf32> -> vector<8x128xf32>
    %c0_4 = arith.constant 0 : index
    %c0_5 = arith.constant 0 : index
    %6 = vector.load %arg4[%c0_4, %c0_5] : memref<1x128xf32, #tpu.memory_space<vmem>>, vector<1x128xf32>
    %7 = vector.broadcast %6 : vector<1x128xf32> to vector<8x128xf32>
    %8 = arith.addf %5, %7 : vector<8x128xf32>
    %c0_6 = arith.constant 0 : index
    %c0_7 = arith.constant 0 : index
    %9 = vector.load %arg5[%c0_6, %c0_7] : memref<8x128xf32, #tpu.memory_space<vmem>>, vector<8x128xf32>
    tpu.vector_store %arg5[%c0_6, %c0_7], %8 {strides = array<i32>} : memref<8x128xf32, #tpu.memory_space<vmem>>, vector<8x128xf32>,
    return
  }
  func.func @transform_0(%arg0: i32, %arg1: i32) -> (i32, i32) {
    %c0_i32 = arith.constant 0 : i32
    %c0_i32_0 = arith.constant 0 : i32
    return %arg0, %c0_i32 : i32, i32
  }
  func.func @transform_1(%arg0: i32, %arg1: i32) -> (i32, i32) {
    %c0_i32 = arith.constant 0 : i32
    %c0_i32_0 = arith.constant 0 : i32
    return %c0_i32, %arg1 : i32, i32
  }
  func.func @transform_2(%arg0: i32, %arg1: i32) -> (i32, i32) {
    %c0_i32 = arith.constant 0 : i32
    %c0_i32_0 = arith.constant 0 : i32
    return %c0_i32, %arg1 : i32, i32
  }
  func.func @transform_3(%arg0: i32, %arg1: i32) -> (i32, i32) {
    %c0_i32 = arith.constant 0 : i32
    return %arg0, %arg1 : i32, i32
  }
}

</mosaic_0001>

<bundles_post_ra>
// kernel: prenorm_linear.1
= control target key start
LH: loop header
LB: loop body
LE: loop exit
PB: predicated region body
PF: predicated region fallthrough
CT: control target
= control target key end

     0   :  { %8 = vsyncpa [#allocation4], 0  ;;  %s790_s0 = inlined_call_operand.hbm [shape: f32[16,32], index: 0, kind: input, shape index: {}]   ;;  %s791_s1 = inlined_call_operand.hbm [shape: bf16[32,128], index: 1, kind: input, shape index: {}]   ;;  %s792_s2 = inlined_call_operand.vmem [shape: f32[1,128], index: 2, kind: input, shape index: {}]   ;;  %s793_s3 = inlined_call_operand.vmem [shape: f32[16,128], index: 3, kind: output, shape index: {}]  }
   0x1   :  { %10 = vsyncpa [#allocation4 + $0x1], 0 }
   0x2   :  { %11 = vsyncpa [#allocation6], 0  ;;  %s670_s12 = smov 0   ;;  %s672_s13 = smov 0  }
   0x3   :  { %s674_s14 = smov 0   ;;  %s676_s15 = smov 0  }
   0x4   :  { %s678_s16 = smov 0   ;;  %s680_s17 = smov 0  }
   0x5 LB: > { %s431_s18 = sadd.s32 4294967295, %s644_s17   ;;  %p433_p0 = scmp.ge.s32.totalorder %s644_s17, 1  ;;  %s644_s17 = sphi %s680_s17, %s17_s17   ;;  %s640_s16 = sphi %s678_s16, %s802_s16   ;;  %s636_s15 = sphi %s676_s15, %s801_s15   ;;  %s632_s14 = sphi %s674_s14, %s800_s14   ;;  %s628_s13 = sphi %s672_s13, %s799_s13   ;;  %s624_s12 = sphi %s670_s12, %s798_s12  }
   0x6   : > { %p702_p1 = scmp.eq.s32.totalorder %s431_s18, 0  ;;  %p140_p2 = scmp.lt.s32.totalorder %s644_s17, 3 }
   0x7   : > { %s153_s22 = sshll.u32 %s791_s1, 4  ;;  %s646_s24 = smov [#allocation5]   ;;  %s154_s22 = int_to_ptr.hbm [resolvable:$true] %s153_s22 }
   0x8   : > { %p710_p3 = pnand %p433_p0, %p140_p2  ;;  %s155_s25 = sshll.u32 %s646_s24, 4  ;;  %s156_s25 = int_to_ptr.vmem [resolvable:$true] %s155_s25 }
   0x9   : > { %s647_s26 = smov 64   ;;  %s648_s27 = smov 4  }
   0xa   : > { %p462_p4 = pneg %p710_p3  ;;  %s29_s28 = sadd.s32 1, %s640_s16 }
   0xb   : > { %p31_p6 = scmp.ge.s32.totalorder %s29_s28, 2  ;;  %p43_p7 = scmp.ne.s32.totalorder %s632_s14, %s628_s13 }
   0xc   : > { %p463_p5 = pnand %p462_p4, %p702_p1  ;;  %p44_p8 = scmp.eq.s32.totalorder %s644_s17, 0 }
   0xd   : > { %s804_s28 = smov (%p31_p6, %s29_s28), 0  ;;  %s36_s29 = sadd.s32 1, %s632_s14 }
   0xe   : > { %465 = dma.hbm_to_vmem [thread:$0]  (!%p463_p5), %s154_s22, 256, %s156_s25, [#allocation6], %s647_s26, %s647_s26, %s648_s27  }
   0xf   : > { %p49_p9 = scmp.ne.s32.totalorder %s628_s13, %s624_s12  ;;  %s33_s30 = ssub.s32 %s640_s16, %s804_s28 }
  0x10   : > { %p729_p10 = por %p44_p8, %p43_p7  ;;  %p34_p11 = scmp.eq.s32.totalorder %s33_s30, 0 }
  0x11   : > { %p735_p12 = por %p702_p1, %p49_p9  ;;  %s175_s6 = sand.u32 1, %s632_s14  }
  0x12   : > { %s438_s7 = sshll.u32 %s640_s16, 3  ;;  %p471_p13 = scmp.lt.s32.totalorder %s644_s17, 2 }
  0x13   : > { %s742_s8 = scalar_select %p34_p11, %s632_s14, %s36_s29  }
  0x14   : > { %s437_s9 = sshll.u32 %s175_s6, 3  ;;  %s183_s12 = scalar_lea.hbm %s790_s0, %s438_s7 }
  0x15   : > { %s185_s18 = sshll.u32 %s183_s12, 4  ;;  %s179_s20 = scalar_lea.vmem [#allocation3], %s437_s9  ;;  %s186_s18 = int_to_ptr.hbm [resolvable:$true] %s185_s18 }
  0x16   : > { %s187_s21 = sshll.u32 %s179_s20, 4  ;;  %p467_p0 = pnand %p471_p13, %p729_p10  ;;  %s188_s21 = int_to_ptr.vmem [resolvable:$true] %s187_s21 }
  0x17   : > { %s176_s22 = scalar_lea.sflag [#allocation4], %s175_s6  ;;  %196 = sbr.rel (%p710_p3) target bundleno = 440 (0x1b8), region = 32 }
  0x18   : > { %469 = dma.hbm_to_vmem [thread:$0]  (!%p467_p0), %s186_s18, 128, %s188_s21, %s176_s22  }
  0x19   : > { %s198_s24 = sand.u32 (!%p710_p3), 1, %s628_s13  }
  0x1a   : > { %s440_s25 = sshll.u32 (!%p710_p3), %s198_s24, 3  ;;  %s199_s26 = scalar_lea.sflag (!%p710_p3), [#allocation4], %s198_s24 }
  0x1b   : > { %s202_s27 = scalar_lea.vmem (!%p710_p3), [#allocation3], %s440_s25 }
  0x1c   : > { %615 = dma.done.wait (%p735_p12), %s199_s26, 128  }
  0x1d   : > { %617 = vsyncadd (%p735_p12), %s199_s26, 4294967168 }
  0x1e   : > { %619 = dma.done.wait (%p702_p1), [#allocation6], 256  }
  0x1f   : > { %621 = vsyncadd (%p702_p1), [#allocation6], 4294967040  ;;  %vm252_vm0 = vcmask 261120   ;;  %v251_v0 = vld [vmem:[%s202_s27] sm:$0xff]  ;;  %v649_v2 = vmov 32.0   ;;  %v455_v14 = vld [vmem:[#allocation5 + $0x8] sm:$0xff] }
  0x20   : > { %v253_v1 = vsel %vm252_vm0, %v251_v0, 0.0  ;;  %526 = vrcp.f32 %v649_v2  ;;  %316 = vmatpush.bf16.msra.mxu0 %v455_v14  ;;  %v454_v15 = vld [vmem:[#allocation5] sm:$0xff]  ;;  %vm283_vm5 = vcmask 257024   ;;  %p239_p1 = scmp.lt.s32.totalorder %s636_s15, 1  ;;  %v525_v29 = vld [vmem:[%s792_s2] ss:$0 sm:$0xff] }
  0x21   : > { %254 = vadd.xlane.f32.xlu0 %v253_v1 }
  0x22   : > { %s806_s15 = smov (!%p239_p1, %s636_s15), 1 }
  0x23   : > { %s442_s19 = sshll.u32 %s806_s15, 3 }
  0x24   : > { %317 = vmatpush.bf16.msra.mxu0 %v454_v15  ;;  %s245_s5 = scalar_lea.vmem %s793_s3, %s442_s19 }
  0x26   : > { %v527_v3 = vpop.eup %526 }
  0x27   : > { %v257_v4 = vmul.f32 32.0, %v527_v3  ;;  %vm261_vm1 = vweird.f32 %v527_v3 }
  0x29   : > { %v258_v5 = vsub.f32 1.0, %v257_v4 }
  0x2b   : > { %v259_v6 = vmul.f32 %v527_v3, %v258_v5 }
  0x2d   : > { %v260_v7 = vadd.f32 %v527_v3, %v259_v6 }
  0x2f   : > { %v262_v8 = vsel %vm261_vm1, %v527_v3, %v260_v7 }
  0x94   : > { %v255_v9 = vpop.xlane.xlu0 %254 }
  0x95   : > { %v263_v10 = vmul.f32 %v262_v8, %v255_v9 }
  0x97   : > { %v264_v11 = vsub.f32 %v251_v0, %v263_v10 }
  0x99   : > { %v265_v12 = vmul.f32 %v264_v11, %v264_v11 }
  0x9b   : > { %v266_v13 = vsel %vm252_vm0, %v265_v12, 0.0 }
  0x9c   : > { %267 = vadd.xlane.f32.xlu0 %v266_v13 }
 0x10f   : > { %v268_v16 = vpop.xlane.xlu0 %267 }
 0x110   : > { %v269_v17 = vmul.f32 %v268_v16, %v262_v8 }
 0x112   : > { %v270_v18 = vadd.f32 1e-05, %v269_v17 }
 0x114   : > { %528 = vrsqrt.f32 %v270_v18  ;;  %vm277_vm3 = vweird.f32 %v270_v18 }
 0x11a   : > { %v529_v19 = vpop.eup %528 }
 0x11b   : > { %v272_v20 = vmul.f32 %v529_v19, %v270_v18  ;;  %vm278_vm2 = vweird.f32 %v529_v19 }
 0x11c   : > { %vm279_vm4 = vmor %vm277_vm3, %vm278_vm2 }
 0x11d   : > { %v273_v21 = vmul.f32 %v529_v19, %v272_v20 }
 0x11f   : > { %v274_v22 = vmul.f32 0.5, %v273_v21 }
 0x121   : > { %v275_v23 = vsub.f32 1.5, %v274_v22 }
 0x123   : > { %v276_v24 = vmul.f32 %v529_v19, %v275_v23 }
 0x125   : > { %v280_v25 = vsel %vm279_vm4, %v529_v19, %v276_v24 }
 0x126   : > { %v281_v26 = vmul.f32 %v280_v25, %v264_v11 }
 0x128   : > { %v282_v27 = vpack.c.bf16 %v281_v26, %v281_v26 }
 0x12a   : > { %284 = vst.msk [vmem:[#allocation2] sm:$0xf] %vm283_vm5, %v282_v27 }
 0x131   : > { %v285_v28 = vld [vmem:[#allocation2] sm:$0xf] }
 0x132   : > { %451 = vmatmul.msk.bf16.vlgmr.msra.gmra.mxu0 %vm252_vm0, %v285_v28 }
 0x1af   : > { %v319_v30 = vpop.f32.mrf.mxu0 }
 0x1b0   : > { %v320_v31 = vadd.f32 %v525_v29, %v319_v30 }
 0x1b2   : > { %323 = vst [vmem:[%s245_s5] sm:$0xff] %v320_v31 }
 0x1b7   : > { %v321_v32 = vpop.f32.mrf.mxu0 }
 0x1b8 PF: > { %s17_s17 = sadd.s32 1, %s644_s17   ;;  %s798_s12 = smov %s628_s13 }
 0x1b9   : > { %p14_p2 = scmp.ge.s32.totalorder %s17_s17, 4   ;;  %s799_s13 = smov %s632_s14 }
 0x1ba   : > { %s800_s14 = smov %s742_s8  ;;  %s801_s15 = smov %s640_s16 }
 0x1bb   : > { %s802_s16 = smov %s804_s28  ;;  %16 = sbr.rel (!%p14_p2) target bundleno = 5 (0x5), region = 84 }
 0x1c0   :  { %349 = vsyncpa [#allocation4], 1 }
 0x1c1   :  { %351 = vsyncpa [#allocation4 + $0x1], 1 }
 0x1c2   :  { %352 = vsyncpa [#allocation6], 1 }

</bundles_post_ra>
